<compile_context>
chip_gen: v7x
topology: tpu7x:2x2x1
jax: 0.10.0
libtpu: 0.0.40
codegen_flags: <defaults>
</compile_context>

<pallas_src>
import jax
import jax.numpy as jnp
from jax.experimental import pallas as pl
from jax.experimental.pallas import tpu as pltpu

LN_EPS = 1e-5  # PyTorch nn.LayerNorm default


def _round_up(x, m):
    return ((x + m - 1) // m) * m


def _pooler_end_logits_kernel(hs_ref, sp_ref, w0h_ref, w0s_ref, b0_ref,
                              g_ref, beta_ref, w1_ref, b1_ref, o_ref):
    # hs_ref:   (TR, H - C)   row tile of hidden_states
    # sp_ref:   (TR, C)       row tile of start_positions
    # w0h_ref:  (H - C, H)    dense_0 weight rows acting on hidden_states
    # w0s_ref:  (C, H)        dense_0 weight rows acting on start_positions
    # b0_ref:   (1, H)
    # g_ref:    (1, H)        LayerNorm gamma
    # beta_ref: (1, H)        LayerNorm beta
    # w1_ref:   (H, Cp)       dense_1 weight, zero-padded to lane-dense Cp
    # b1_ref:   (1, Cp)
    # o_ref:    (TR, Cp)

    # dense_0 on the (virtual) concat == split matmul with shared f32 accumulator.
    h = jnp.dot(hs_ref[...], w0h_ref[...], preferred_element_type=jnp.float32)
    h = h + jnp.dot(sp_ref[...], w0s_ref[...],
                    preferred_element_type=jnp.float32)
    h = h + b0_ref[...].astype(jnp.float32)

    # tanh activation (EUP).
    h = jnp.tanh(h)

    # LayerNorm over the hidden dim (biased variance, like PyTorch).
    mean = jnp.mean(h, axis=-1, keepdims=True)
    centered = h - mean
    var = jnp.mean(centered * centered, axis=-1, keepdims=True)
    hn = centered * jax.lax.rsqrt(var + LN_EPS)
    hn = hn * g_ref[...].astype(jnp.float32) + beta_ref[...].astype(jnp.float32)

    # dense_1 into the lane-dense padded output.
    out = jnp.dot(hn.astype(w1_ref.dtype), w1_ref[...],
                  preferred_element_type=jnp.float32)
    out = out + b1_ref[...].astype(jnp.float32)
    o_ref[...] = out.astype(o_ref.dtype)


def pooler_end_logits(hidden_states, start_positions, params, *, row_tile=256):
    """Fused dense_0 -> tanh -> LayerNorm -> dense_1 on TPU via Pallas."""
    w0, b0, gamma, beta, w1, b1 = params
    B, S, Hh = hidden_states.shape          # Hh = H - C
    C_in = start_positions.shape[-1]
    H = w0.shape[0]
    assert Hh + C_in == H, "concat width must equal hidden_size"
    out_dim = w1.shape[1]
    R = B * S

    # Row tiling: large tiles fill the MXU M dimension and amortize per-step
    # overhead; clamp for tiny inputs, pad rows to a tile multiple (padding rows
    # are all-zero and sliced off below — no NaNs, LN of a constant row is safe).
    tr = _round_up(min(row_tile, _round_up(R, 8)), 8)
    R_pad = _round_up(R, tr)

    hs = hidden_states.reshape(R, Hh)
    sp = start_positions.reshape(R, C_in)
    if R_pad != R:
        hs = jnp.pad(hs, ((0, R_pad - R), (0, 0)))
        sp = jnp.pad(sp, ((0, R_pad - R), (0, 0)))

    # Split dense_0 weight so the concat never materializes in HBM.
    w0_hs = w0[:Hh, :]
    w0_sp = w0[Hh:, :]

    # Lane-dense (>=128, multiple-of-128) output: zero-pad dense_1 columns.
    Cp = max(128, _round_up(out_dim, 128))
    w1_p = jnp.pad(w1, ((0, 0), (0, Cp - out_dim)))
    b1_p = jnp.pad(b1, ((0, Cp - out_dim),)).reshape(1, Cp)

    b0_2d = b0.reshape(1, H)
    g_2d = gamma.reshape(1, H)
    beta_2d = beta.reshape(1, H)

    # Grid-invariant operands: single-buffer them (constant index_map), so they
    # don't pay 2x VMEM like the default double-buffering would.
    resident = dict(pipeline_mode=pl.Buffered(1))

    grid = (R_pad // tr,)
    out = pl.pallas_call(
        _pooler_end_logits_kernel,
        out_shape=jax.ShapeDtypeStruct((R_pad, Cp), jnp.float32),
        grid_spec=pl.GridSpec(
            grid=grid,
            in_specs=[
                pl.BlockSpec((tr, Hh), lambda i: (i, 0)),               # hs tile
                pl.BlockSpec((tr, C_in), lambda i: (i, 0)),             # sp tile
                pl.BlockSpec((Hh, H), lambda i: (0, 0), **resident),    # w0_hs
                pl.BlockSpec((C_in, H), lambda i: (0, 0), **resident),  # w0_sp
                pl.BlockSpec((1, H), lambda i: (0, 0), **resident),     # b0
                pl.BlockSpec((1, H), lambda i: (0, 0), **resident),     # gamma
                pl.BlockSpec((1, H), lambda i: (0, 0), **resident),     # beta
                pl.BlockSpec((H, Cp), lambda i: (0, 0), **resident),    # w1 (padded)
                pl.BlockSpec((1, Cp), lambda i: (0, 0), **resident),    # b1 (padded)
            ],
            out_specs=pl.BlockSpec((tr, Cp), lambda i: (i, 0)),
        ),
        compiler_params=pltpu.CompilerParams(
            dimension_semantics=("parallel",)),
    )(hs, sp, w0_hs, w0_sp, b0_2d, g_2d, beta_2d, w1_p, b1_p)

    return out[:R, :out_dim].reshape(B, S, out_dim)


def _reference(hidden_states, start_positions, params):
    """Pure-JAX reference matching the PyTorch forward semantics."""
    w0, b0, gamma, beta, w1, b1 = params
    x = jnp.concatenate([hidden_states, start_positions], axis=-1)
    x = x @ w0 + b0
    x = jnp.tanh(x)
    mean = jnp.mean(x, axis=-1, keepdims=True)
    var = jnp.mean((x - mean) ** 2, axis=-1, keepdims=True)
    x = (x - mean) / jnp.sqrt(var + LN_EPS)
    x = x * gamma + beta
    return x @ w1 + b1


if __name__ == "__main__":
    # Small shapes consistent with the module:
    #   hidden_size H = 32, num_classes C = 4, batch B = 2, seq S = 8.
    B, S, H, C = 2, 8, 32, 4

    key = jax.random.PRNGKey(0)
    k_hs, k_sp, k_w0, k_b0, k_g, k_bt, k_w1, k_b1 = jax.random.split(key, 8)

    hidden_states = jax.random.normal(k_hs, (B, S, H - C), dtype=jnp.float32)
    start_positions = jax.random.normal(k_sp, (B, S, C), dtype=jnp.float32)

    # Deterministic synthetic parameters (stored as (in, out), i.e. W^T vs. PyTorch).
    w0 = jax.random.normal(k_w0, (H, H), dtype=jnp.float32) * 0.05
    b0 = jax.random.normal(k_b0, (H,), dtype=jnp.float32) * 0.02
    gamma = 1.0 + 0.1 * jax.random.normal(k_g, (H,), dtype=jnp.float32)
    beta = 0.1 * jax.random.normal(k_bt, (H,), dtype=jnp.float32)
    w1 = jax.random.normal(k_w1, (H, C), dtype=jnp.float32) * 0.05
    b1 = jax.random.normal(k_b1, (C,), dtype=jnp.float32) * 0.02
    params = (w0, b0, gamma, beta, w1, b1)

    out = pooler_end_logits(hidden_states, start_positions, params)
    out = jax.block_until_ready(out)

    ref = _reference(hidden_states, start_positions, params)
    assert out.shape == (B, S, C), out.shape
    assert jnp.allclose(out, ref, atol=1e-4, rtol=1e-4), (
        float(jnp.max(jnp.abs(out - ref))))

    print("KERNEL_OK")
</pallas_src>

<mosaic_0001>
module attributes {stable_mosaic.version = 11 : i64} {
  func.func @_pooler_end_logits_kernel(%arg0: i32, %arg1: memref<16x28xf32, #tpu.memory_space<vmem>>, %arg2: memref<16x4xf32, #tpu.memory_space<vmem>>, %arg3: memref<28x32xf32, #tpu.memory_space<vmem>>, %arg4: memref<4x32xf32, #tpu.memory_space<vmem>>, %arg5: memref<1x32xf32, #tpu.memory_space<vmem>>, %arg6: memref<1x32xf32, #tpu.memory_space<vmem>>, %arg7: memref<1x32xf32, #tpu.memory_space<vmem>>, %arg8: memref<32x128xf32, #tpu.memory_space<vmem>>, %arg9: memref<1x128xf32, #tpu.memory_space<vmem>>, %arg10: memref<16x128xf32, #tpu.memory_space<vmem>>) attributes {dimension_semantics = [#tpu.dimension_semantics<parallel>], iteration_bounds = array<i64: 1>, scalar_prefetch = 0 : i64, scratch_operands = 0 : i64, tpu.core_type = #tpu.core_type<tc>, window_params = [{transform_indices = @transform_0, window_bounds = array<i64: 16, 28>}, {transform_indices = @transform_1, window_bounds = array<i64: 16, 4>}, {pipeline_mode = #tpu.pipeline_mode<synchronous>, transform_indices = @transform_2, window_bounds = array<i64: 28, 32>}, {pipeline_mode = #tpu.pipeline_mode<synchronous>, transform_indices = @transform_3, window_bounds = array<i64: 4, 32>}, {pipeline_mode = #tpu.pipeline_mode<synchronous>, transform_indices = @transform_4, window_bounds = array<i64: 1, 32>}, {pipeline_mode = #tpu.pipeline_mode<synchronous>, transform_indices = @transform_5, window_bounds = array<i64: 1, 32>}, {pipeline_mode = #tpu.pipeline_mode<synchronous>, transform_indices = @transform_6, window_bounds = array<i64: 1, 32>}, {pipeline_mode = #tpu.pipeline_mode<synchronous>, transform_indices = @transform_7, window_bounds = array<i64: 32, 128>}, {pipeline_mode = #tpu.pipeline_mode<synchronous>, transform_indices = @transform_8, window_bounds = array<i64: 1, 128>}, {transform_indices = @transform_9, window_bounds = array<i64: 16, 128>}]} {
    %c0 = arith.constant 0 : index
    %c0_0 = arith.constant 0 : index
    %0 = vector.load %arg1[%c0, %c0_0] : memref<16x28xf32, #tpu.memory_space<vmem>>, vector<16x28xf32>
    %c0_1 = arith.constant 0 : index
    %c0_2 = arith.constant 0 : index
    %1 = vector.load %arg3[%c0_1, %c0_2] : memref<28x32xf32, #tpu.memory_space<vmem>>, vector<28x32xf32>
    %cst = arith.constant dense<0.000000e+00> : vector<16x32xf32>
    %2 = tpu.matmul %0, %1, %cst {dimension_numbers = #tpu.dot_dimension_numbers<[1], [0], [0], [1], [0, 0, 1, 1], [], []>} : vector<16x28xf32>, vector<28x32xf32>, vector<16x32xf32> -> vector<16x32xf32>
    %c0_3 = arith.constant 0 : index
    %c0_4 = arith.constant 0 : index
    %3 = vector.load %arg2[%c0_3, %c0_4] : memref<16x4xf32, #tpu.memory_space<vmem>>, vector<16x4xf32>
    %c0_5 = arith.constant 0 : index
    %c0_6 = arith.constant 0 : index
    %4 = vector.load %arg4[%c0_5, %c0_6] : memref<4x32xf32, #tpu.memory_space<vmem>>, vector<4x32xf32>
    %cst_7 = arith.constant dense<0.000000e+00> : vector<16x32xf32>
    %5 = tpu.matmul %3, %4, %cst_7 {dimension_numbers = #tpu.dot_dimension_numbers<[1], [0], [0], [1], [0, 0, 1, 1], [], []>} : vector<16x4xf32>, vector<4x32xf32>, vector<16x32xf32> -> vector<16x32xf32>
    %6 = arith.addf %2, %5 : vector<16x32xf32>
    %c0_8 = arith.constant 0 : index
    %c0_9 = arith.constant 0 : index
    %7 = vector.load %arg5[%c0_8, %c0_9] : memref<1x32xf32, #tpu.memory_space<vmem>>, vector<1x32xf32>
    %8 = vector.broadcast %7 : vector<1x32xf32> to vector<16x32xf32>
    %9 = arith.addf %6, %8 : vector<16x32xf32>
    %10 = math.tanh %9 : vector<16x32xf32>
    %cst_10 = arith.constant dense<0.000000e+00> : vector<16xf32>
    %11 = vector.multi_reduction <add>, %10, %cst_10 [1] : vector<16x32xf32> to vector<16xf32>
    %12 = vector.shape_cast %11 : vector<16xf32> to vector<16x1xf32>
    %cst_11 = arith.constant 3.200000e+01 : f32
    %13 = vector.broadcast %cst_11 : f32 to vector<16x1xf32>
    %14 = arith.divf %12, %13 : vector<16x1xf32>
    %15 = vector.broadcast %14 : vector<16x1xf32> to vector<16x32xf32>
    %16 = arith.subf %10, %15 : vector<16x32xf32>
    %17 = arith.mulf %16, %16 : vector<16x32xf32>
    %cst_12 = arith.constant dense<0.000000e+00> : vector<16xf32>
    %18 = vector.multi_reduction <add>, %17, %cst_12 [1] : vector<16x32xf32> to vector<16xf32>
    %19 = vector.shape_cast %18 : vector<16xf32> to vector<16x1xf32>
    %cst_13 = arith.constant 3.200000e+01 : f32
    %20 = vector.broadcast %cst_13 : f32 to vector<16x1xf32>
    %21 = arith.divf %19, %20 : vector<16x1xf32>
    %cst_14 = arith.constant 9.99999974E-6 : f32
    %22 = vector.broadcast %cst_14 : f32 to vector<16x1xf32>
    %23 = arith.addf %21, %22 : vector<16x1xf32>
    %24 = math.rsqrt %23 : vector<16x1xf32>
    %25 = vector.broadcast %24 : vector<16x1xf32> to vector<16x32xf32>
    %26 = arith.mulf %16, %25 : vector<16x32xf32>
    %c0_15 = arith.constant 0 : index
    %c0_16 = arith.constant 0 : index
    %27 = vector.load %arg6[%c0_15, %c0_16] : memref<1x32xf32, #tpu.memory_space<vmem>>, vector<1x32xf32>
    %28 = vector.broadcast %27 : vector<1x32xf32> to vector<16x32xf32>
    %29 = arith.mulf %26, %28 : vector<16x32xf32>
    %c0_17 = arith.constant 0 : index
    %c0_18 = arith.constant 0 : index
    %30 = vector.load %arg7[%c0_17, %c0_18] : memref<1x32xf32, #tpu.memory_space<vmem>>, vector<1x32xf32>
    %31 = vector.broadcast %30 : vector<1x32xf32> to vector<16x32xf32>
    %32 = arith.addf %29, %31 : vector<16x32xf32>
    %c0_19 = arith.constant 0 : index
    %c0_20 = arith.constant 0 : index
    %33 = vector.load %arg8[%c0_19, %c0_20] : memref<32x128xf32, #tpu.memory_space<vmem>>, vector<32x128xf32>
    %cst_21 = arith.constant dense<0.000000e+00> : vector<16x128xf32>
    %34 = tpu.matmul %32, %33, %cst_21 {dimension_numbers = #tpu.dot_dimension_numbers<[1], [0], [0], [1], [0, 0, 1, 1], [], []>} : vector<16x32xf32>, vector<32x128xf32>, vector<16x128xf32> -> vector<16x128xf32>
    %c0_22 = arith.constant 0 : index
    %c0_23 = arith.constant 0 : index
    %35 = vector.load %arg9[%c0_22, %c0_23] : memref<1x128xf32, #tpu.memory_space<vmem>>, vector<1x128xf32>
    %36 = vector.broadcast %35 : vector<1x128xf32> to vector<16x128xf32>
    %37 = arith.addf %34, %36 : vector<16x128xf32>
    %c0_24 = arith.constant 0 : index
    %c0_25 = arith.constant 0 : index
    %38 = vector.load %arg10[%c0_24, %c0_25] : memref<16x128xf32, #tpu.memory_space<vmem>>, vector<16x128xf32>
    tpu.vector_store %arg10[%c0_24, %c0_25], %37 {strides = array<i32>} : memref<16x128xf32, #tpu.memory_space<vmem>>, vector<16x128xf32>,
    return
  }
  func.func @transform_0(%arg0: i32) -> (i32, i32) {
    %c0_i32 = arith.constant 0 : i32
    %c0_i32_0 = arith.constant 0 : i32
    return %arg0, %c0_i32 : i32, i32
  }
  func.func @transform_1(%arg0: i32) -> (i32, i32) {
    %c0_i32 = arith.constant 0 : i32
    %c0_i32_0 = arith.constant 0 : i32
    return %arg0, %c0_i32 : i32, i32
  }
  func.func @transform_2(%arg0: i32) -> (i32, i32) {
    %c0_i32 = arith.constant 0 : i32
    %c0_i32_0 = arith.constant 0 : i32
    %c0_i32_1 = arith.constant 0 : i32
    return %c0_i32, %c0_i32_0 : i32, i32
  }
  func.func @transform_3(%arg0: i32) -> (i32, i32) {
    %c0_i32 = arith.constant 0 : i32
    %c0_i32_0 = arith.constant 0 : i32
    %c0_i32_1 = arith.constant 0 : i32
    return %c0_i32, %c0_i32_0 : i32, i32
  }
  func.func @transform_4(%arg0: i32) -> (i32, i32) {
    %c0_i32 = arith.constant 0 : i32
    %c0_i32_0 = arith.constant 0 : i32
    %c0_i32_1 = arith.constant 0 : i32
    return %c0_i32, %c0_i32_0 : i32, i32
  }
  func.func @transform_5(%arg0: i32) -> (i32, i32) {
    %c0_i32 = arith.constant 0 : i32
    %c0_i32_0 = arith.constant 0 : i32
    %c0_i32_1 = arith.constant 0 : i32
    return %c0_i32, %c0_i32_0 : i32, i32
  }
  func.func @transform_6(%arg0: i32) -> (i32, i32) {
    %c0_i32 = arith.constant 0 : i32
    %c0_i32_0 = arith.constant 0 : i32
    %c0_i32_1 = arith.constant 0 : i32
    return %c0_i32, %c0_i32_0 : i32, i32
  }
  func.func @transform_7(%arg0: i32) -> (i32, i32) {
    %c0_i32 = arith.constant 0 : i32
    %c0_i32_0 = arith.constant 0 : i32
    %c0_i32_1 = arith.constant 0 : i32
    return %c0_i32, %c0_i32_0 : i32, i32
  }
  func.func @transform_8(%arg0: i32) -> (i32, i32) {
    %c0_i32 = arith.constant 0 : i32
    %c0_i32_0 = arith.constant 0 : i32
    %c0_i32_1 = arith.constant 0 : i32
    return %c0_i32, %c0_i32_0 : i32, i32
  }
  func.func @transform_9(%arg0: i32) -> (i32, i32) {
    %c0_i32 = arith.constant 0 : i32
    %c0_i32_0 = arith.constant 0 : i32
    return %arg0, %c0_i32 : i32, i32
  }
}

</mosaic_0001>

<bundles_post_ra>
// kernel: tpu_custom_call.1
= control target key start
LH: loop header
LB: loop body
LE: loop exit
PB: predicated region body
PF: predicated region fallthrough
CT: control target
= control target key end

     0   :  { %14 = vsyncpa [#allocation3], 0  ;;  %s713_s0 = inlined_call_operand.hbm [shape: f32[16,28], index: 0, kind: input, shape index: {}]   ;;  %s714_s1 = inlined_call_operand.vmem [shape: f32[16,4], index: 1, kind: input, shape index: {}]   ;;  %s715_s2 = inlined_call_operand.hbm [shape: f32[28,32], index: 2, kind: input, shape index: {}]   ;;  %s716_s3 = inlined_call_operand.vmem [shape: f32[4,32], index: 3, kind: input, shape index: {}]   ;;  %s717_s4 = inlined_call_operand.vmem [shape: f32[1,32], index: 4, kind: input, shape index: {}]   ;;  %s718_s5 = inlined_call_operand.vmem [shape: f32[1,32], index: 5, kind: input, shape index: {}]   ;;  %s719_s6 = inlined_call_operand.vmem [shape: f32[1,32], index: 6, kind: input, shape index: {}]   ;;  %s720_s7 = inlined_call_operand.vmem [shape: f32[32,128], index: 7, kind: input, shape index: {}]   ;;  %s721_s8 = inlined_call_operand.vmem [shape: f32[1,128], index: 8, kind: input, shape index: {}]   ;;  %s722_s9 = inlined_call_operand.hbm [shape: f32[16,128], index: 9, kind: output, shape index: {}]  }
   0x1   :  { %15 = vsyncpa [#allocation6], 0 }
   0x2   :  { %16 = vsyncpa [#allocation4], 0  ;;  %s570_s30 = smov [#allocation2]   ;;  %s498_s13 = scalar_lea.hbm %s713_s0, 256 }
   0x3   :  { %s22_s10 = sshll.u32 %s570_s30, 4  ;;  %p499_p0 = scmp.ne.s32.totalorder %s713_s0, %s498_s13  ;;  %s23_s10 = int_to_ptr.vmem [resolvable:$true] %s22_s10 }
   0x4   :  { %p502_p1 = scmp.lt.u32.totalorder %s498_s13, %s713_s0 }
   0x6   :  { %p504_p2 = pnand %p502_p1, %p499_p0 }
   0x8   :  { %507 = shalt.err (!%p504_p2)
}
   0x9   :  { %s508_s18 = scalar_lea.vmem %s23_s10, 256  ;;  %p513_p4 = scmp.lt.s32.totalorder %s23_s10, %s23_s10 }
   0xa   :  { %p509_p3 = scmp.ne.s32.totalorder %s23_s10, %s508_s18  ;;  %p514_p5 = scmp.lt.s32.totalorder %s508_s18, %s508_s18 }
   0xc   :  { %p515_p6 = por %p514_p5, %p513_p4 }
   0xe   :  { %p516_p7 = pnand %p515_p6, %p509_p3 }
  0x10   :  { %519 = shalt.err (!%p516_p7)
}
  0x11   :  { %s571_s19 = smov 128   ;;  %s572_s20 = smov 8  }
  0x12   :  { %28 = dma.hbm_to_vmem [thread:$0]  %s713_s0, 256, %s23_s10, [#allocation3], %s571_s19, %s571_s19, %s572_s20  }
  0x13   :  { %s573_s23 = smov [#allocation5]   ;;  %s520_s27 = scalar_lea.hbm %s715_s2, 512 }
  0x14   :  { %s36_s24 = sshll.u32 %s573_s23, 4  ;;  %p521_p8 = scmp.ne.s32.totalorder %s715_s2, %s520_s27  ;;  %s37_s24 = int_to_ptr.vmem [resolvable:$true] %s36_s24 }
  0x15   :  { %p524_p9 = scmp.lt.u32.totalorder %s520_s27, %s715_s2 }
  0x17   :  { %p526_p10 = pnand %p524_p9, %p521_p8 }
  0x19   :  { %529 = shalt.err (!%p526_p10)
}
  0x1a   :  { %s530_s12 = scalar_lea.vmem %s37_s24, 512  ;;  %p535_p12 = scmp.lt.s32.totalorder %s37_s24, %s37_s24 }
  0x1b   :  { %p531_p11 = scmp.ne.s32.totalorder %s37_s24, %s530_s12  ;;  %p536_p13 = scmp.lt.s32.totalorder %s530_s12, %s530_s12 }
  0x1d   :  { %p537_p0 = por %p536_p13, %p535_p12 }
  0x1f   :  { %p538_p1 = pnand %p537_p0, %p531_p11 }
  0x21   :  { %541 = shalt.err (!%p538_p1)
}
  0x22   :  { %42 = dma.hbm_to_vmem [thread:$0]  %s715_s2, 512, %s37_s24, [#allocation6], %s571_s19, %s571_s19, %s572_s20  }
  0x23   :  { %564 = dma.done.wait [#allocation3], 256  }
  0x24   :  { %565 = vsyncadd [#allocation3], 4294967040 }
  0x25   :  { %566 = dma.done.wait [#allocation6], 512  }
  0x26   :  { %567 = vsyncadd [#allocation6], 4294966784  ;;  %vm77_vm0 = vcmask 1043456   ;;  %vm70_vm1 = vcmask 31744   ;;  %v69_v0 = vld [vmem:[%s716_s3] sm:$0xf] }
  0x27   :  { %v67_v1 = vld [vmem:[%s714_s1] sm:$0xff]  ;;  %v68_v2 = vld [vmem:[%s714_s1 + $0x8] sm:$0xff]  ;;  %437 = vmatprep.subr.msk.mxu0 %vm77_vm0, %v69_v0  ;;  %v63_v3 = vld [vmem:[#allocation5] sm:$0xff]  ;;  %vm156_vm2 = vcmask 228352   ;;  %vm574_vm3 = vmmov 1   ;;  %vm252_vm5 = vcmask 261120  }
  0x28   :  { %439 = vmatprep.mubr.msk.f32.mxu0 %vm70_vm1, %v67_v1  ;;  %v64_v4 = vld [vmem:[#allocation5 + $0x8] sm:$0xff]  ;;  %v65_v5 = vld [vmem:[#allocation5 + $0x10] sm:$0xff]  ;;  %438 = vmatpush3.msk.msra.mxu0 %vm77_vm0, %v69_v0  ;;  %v66_v7 = vld [vmem:[#allocation5 + $0x18] sm:$0xf] }
  0x29   :  { %v464_v6 = vpack.c.bf16 %v64_v4, %v63_v3  ;;  %v61_v8 = vld [vmem:[#allocation2] sm:$0xff]  ;;  %440 = vmatmul.mubr.msk.f32.vlgmr.msra.gmra.mrb[0].mxu0 %vm70_vm1, %v68_v2  ;;  %v468_v9 = vpack.c.bf16 %v66_v7, %v65_v5  ;;  %vm469_vm4 = vmpackc.low %vm77_vm0, %vm574_vm3  ;;  %v62_v10 = vld [vmem:[#allocation2 + $0x8] sm:$0xff] }
  0x2a   :  { %450 = vmatprep.mubr.msk.f32.mxu0 %vm156_vm2, %v61_v8  ;;  %v416_v11 = vld [vmem:[%s717_s4] ss:$0 sm:$0xff]  ;;  %v299_v31 = vld [vmem:[%s720_s7 + $0x8] sm:$0xff]  ;;  %v300_v32 = vld [vmem:[%s720_s7 + $0x10] sm:$0xff] }
  0x2b   :  { %465 = vmatprep.subr.bf16.mxu0 %v464_v6  ;;  %v298_v30 = vld [vmem:[%s720_s7] sm:$0xff]  ;;  %v301_v34 = vld [vmem:[%s720_s7 + $0x18] sm:$0xff] }
  0x2c   :  { %467 = vmatpush3.bf16.msra.mxu0 %v464_v6  ;;  %v474_v33 = vpack.c.bf16 %v299_v31, %v298_v30  ;;  %v478_v35 = vpack.c.bf16 %v301_v34, %v300_v32  ;;  %v417_v43 = vld [vmem:[%s718_s5] ss:$0 sm:$0xff]  ;;  %s575_s5 = smov [#allocation7]  }
  0x2d   :  { %470 = vmatprep.subr.msk.bf16.mxu0 %vm469_vm4, %v468_v9  ;;  %v418_v45 = vld [vmem:[%s719_s6] ss:$0 sm:$0xff]  ;;  %s397_s12 = sshll.u32 %s575_s5, 4  ;;  %s398_s12 = int_to_ptr.vmem [resolvable:$true] %s397_s12 }
  0x2e   :  { %475 = vmatprep.subr.bf16.mxu1 %v474_v33  ;;  %v419_v52 = vld [vmem:[%s721_s8] ss:$0 sm:$0xff]  ;;  %s542_s6 = scalar_lea.vmem %s398_s12, 256  ;;  %p547_p3 = scmp.lt.s32.totalorder %s398_s12, %s398_s12 }
  0x2f   :  { %477 = vmatpush3.bf16.msra.mxu1 %v474_v33  ;;  %p543_p2 = scmp.ne.s32.totalorder %s398_s12, %s542_s6  ;;  %p548_p4 = scmp.lt.s32.totalorder %s542_s6, %s542_s6 }
  0x30   :  { %473 = vmatpush3.bf16.msk.msra.mxu0 %vm469_vm4, %v468_v9  ;;  %479 = vmatprep.subr.bf16.mxu1 %v478_v35 }
  0x31   :  { %p549_p5 = por %p548_p4, %p547_p3 }
  0x33   :  { %451 = vmatmul.mubr.msk.f32.vlgmr.msra.gmra.mrb[0].mxu0 %vm156_vm2, %v62_v10  ;;  %481 = vmatpush3.bf16.msra.mxu1 %v478_v35  ;;  %p550_p6 = pnand %p549_p5, %p543_p2 }
 0x106   :  { %v452_v12 = vpop.f32.mrb[0].mxu0 }
 0x107   :  { %v232_v13 = vpop.f32.mrb[1].mxu0  ;;  %v249_v14 = vadd.f32 %v452_v12, %v416_v11 }
 0x108   :  { %v248_v15 = vadd.f32 %v416_v11, %v232_v13 }
 0x10a   :  { %490 = vtanh.f32 %v248_v15 }
 0x10b   :  { %492 = vtanh.f32 %v249_v14 }
 0x114   :  { %v491_v16 = vpop.eup %490 }
 0x115   :  { %v253_v17 = vsel %vm252_vm5, %v491_v16, 0.0  ;;  %v493_v18 = vpop.eup %492 }
 0x116   :  { %254 = vadd.xlane.f32.xlu0 %v253_v17  ;;  %v256_v19 = vsel %vm252_vm5, %v493_v18, 0.0 }
 0x11a   :  { %257 = vadd.xlane.f32.xlu0 %v256_v19 }
 0x1a3   :  { %v255_v20 = vpop.xlane.xlu0 %254 }
 0x1a4   :  { %v260_v21 = vmul.f32 0.03125, %v255_v20 }
 0x1a6   :  { %v262_v22 = vsub.f32 %v491_v16, %v260_v21 }
 0x1a7   :  { %v258_v23 = vpop.xlane.xlu0 %257 }
 0x1a8   :  { %v261_v24 = vmul.f32 0.03125, %v258_v23  ;;  %v264_v25 = vmul.f32 %v262_v22, %v262_v22 }
 0x1aa   :  { %v263_v26 = vsub.f32 %v493_v18, %v261_v24  ;;  %v266_v27 = vsel %vm252_vm5, %v264_v25, 0.0 }
 0x1ab   :  { %267 = vadd.xlane.f32.xlu1 %v266_v27 }
 0x1ac   :  { %v265_v28 = vmul.f32 %v263_v26, %v263_v26 }
 0x1ae   :  { %v269_v29 = vsel %vm252_vm5, %v265_v28, 0.0 }
 0x1af   :  { %270 = vadd.xlane.f32.xlu1 %v269_v29 }
 0x238   :  { %v268_v36 = vpop.xlane.xlu1 %267 }
 0x239   :  { %v272_v37 = vmul.f32 0.03125, %v268_v36 }
 0x23b   :  { %v274_v38 = vadd.f32 1e-05, %v272_v37 }
 0x23c   :  { %v271_v39 = vpop.xlane.xlu1 %270 }
 0x23d   :  { %494 = vrsqrt.f32 %v274_v38  ;;  %v273_v40 = vmul.f32 0.03125, %v271_v39 }
 0x23f   :  { %v275_v41 = vadd.f32 1e-05, %v273_v40 }
 0x241   :  { %496 = vrsqrt.f32 %v275_v41 }
 0x247   :  { %v495_v42 = vpop.eup %494 }
 0x248   :  { %v278_v44 = vmul.f32 %v495_v42, %v262_v22 }
 0x24a   :  { %v287_v46 = vmul.f32 %v417_v43, %v278_v44 }
 0x24b   :  { %v497_v47 = vpop.eup %496 }
 0x24c   :  { %v279_v48 = vmul.f32 %v497_v47, %v263_v26  ;;  %v296_v49 = vadd.f32 %v418_v45, %v287_v46 }
 0x24e   :  { %v288_v50 = vmul.f32 %v417_v43, %v279_v48  ;;  %461 = vmatprep.mubr.msk.f32.mxu1 %vm252_vm5, %v296_v49 }
 0x250   :  { %v297_v51 = vadd.f32 %v418_v45, %v288_v50 }
 0x252   :  { %462 = vmatmul.mubr.msk.f32.vlgmr.msra.gmra.mrb[0].mxu1 %vm252_vm5, %v297_v51 }
 0x325   :  { %v463_v53 = vpop.f32.mrb[0].mxu1 }
 0x326   :  { %v387_v54 = vadd.f32 %v463_v53, %v419_v52  ;;  %v381_v55 = vpop.f32.mrb[1].mxu1 }
 0x327   :  { %v382_v56 = vadd.f32 %v419_v52, %v381_v55 }
 0x328   :  { %391 = vst [vmem:[#allocation7 + $0x8] sm:$0xff] %v387_v54 }
 0x329   :  { %390 = vst [vmem:[#allocation7] sm:$0xff] %v382_v56 }
 0x32a   :  { %553 = shalt.err (!%p550_p6)
}
 0x32b   :  { %s554_s8 = scalar_lea.hbm %s722_s9, 256 }
 0x32c   :  { %p555_p7 = scmp.ne.s32.totalorder %s722_s9, %s554_s8  ;;  %p558_p8 = scmp.lt.u32.totalorder %s554_s8, %s722_s9 }
 0x32e   :  { %p560_p9 = pnand %p558_p8, %p555_p7 }
 0x330   :  { %563 = shalt.err (!%p560_p9)
}
 0x331   :  { %403 = dma.vmem_to_hbm [thread:$0]  %s398_s12, 256, %s722_s9, [#allocation4], %s571_s19, %s571_s19, %s572_s20  }
 0x332   :  { %568 = dma.done.wait [#allocation4], 256  }
 0x333   :  { %569 = vsyncadd [#allocation4], 4294967040 }
 0x334   :  { %407 = vsyncpa [#allocation3], 1 }
 0x335   :  { %408 = vsyncpa [#allocation6], 1 }
 0x336   :  { %409 = vsyncpa [#allocation4], 1 }

</bundles_post_ra>
